<compile_context>
chip_gen: v7x
topology: tpu7x:2x2x1
jax: 0.10.0
libtpu: 0.0.40
codegen_flags: <defaults>
</compile_context>

<pallas_src>
import jax
import jax.numpy as jnp
from jax.experimental import pallas as pl
from jax.experimental.pallas import tpu as pltpu


def mlp_kernel(x_ref, w1_ref, b1_ref, w2_ref, b2_ref, w3t_ref, b3_ref, o_ref):
    # x_ref  : [1, TN]      (batch on lanes)
    # w1_ref : [32, 1]   b1_ref : [32, 1]
    # w2_ref : [32, 32]  b2_ref : [32, 1]
    # w3t_ref: [32, 1]   b3_ref : [1, 1]
    # o_ref  : [1, TN]
    x = x_ref[...]                                                  # [1, TN]

    # Layer 1 (Linear(1,32) + ReLU): K=1 -> outer product on the VPU.
    h1 = jnp.maximum(w1_ref[...] * x + b1_ref[...], 0.0)           # [32, TN]

    # Layer 2 (Linear(32,32) + ReLU): the only real matmul -> MXU,
    # batch sits on the MXU N axis (lane-dense, multiple of 128).
    h2 = jnp.dot(w2_ref[...], h1,
                 preferred_element_type=jnp.float32) + b2_ref[...]  # [32, TN]
    h2 = jnp.maximum(h2, 0.0)

    # Layer 3 (Linear(32,1)): multiply + sublane reduce (VPU + XLU),
    # result is already lane-dense [1, TN].
    y = jnp.sum(w3t_ref[...] * h2, axis=0, keepdims=True) + b3_ref[...]
    o_ref[...] = y.astype(o_ref.dtype)


def net_forward(x, params, *, tile_n=1024):
    """x: [N, 1] float32 -> [N, 1] float32 (fused, batch-tiled 3-layer MLP)."""
    w1, b1, w2, b2, w3t, b3 = params
    N = x.shape[0]

    # Lane-dense layout: batch on the last axis.
    xr = x.reshape(1, N)
    n_pad = pl.cdiv(N, tile_n) * tile_n
    if n_pad != N:
        xr = jnp.pad(xr, ((0, 0), (0, n_pad - N)))

    grid = (n_pad // tile_n,)

    out = pl.pallas_call(
        mlp_kernel,
        out_shape=jax.ShapeDtypeStruct((1, n_pad), jnp.float32),
        grid_spec=pltpu.PrefetchScalarGridSpec(
            num_scalar_prefetch=0,
            grid=grid,
            in_specs=[
                # Batch tile of the input, walks along the lane axis.
                pl.BlockSpec((1, tile_n), lambda i: (0, i)),
                # Weights / biases: constant index maps -> resident across steps.
                pl.BlockSpec((32, 1), lambda i: (0, 0)),   # w1
                pl.BlockSpec((32, 1), lambda i: (0, 0)),   # b1
                pl.BlockSpec((32, 32), lambda i: (0, 0)),  # w2
                pl.BlockSpec((32, 1), lambda i: (0, 0)),   # b2
                pl.BlockSpec((32, 1), lambda i: (0, 0)),   # w3^T
                pl.BlockSpec((1, 1), lambda i: (0, 0)),    # b3
            ],
            out_specs=pl.BlockSpec((1, tile_n), lambda i: (0, i)),
        ),
        compiler_params=pltpu.CompilerParams(
            dimension_semantics=("parallel",),
        ),
    )(xr, w1, b1, w2, b2, w3t, b3)

    return out[:, :N].reshape(N, 1)


def init_params(key):
    """PyTorch-default-style init, U(-1/sqrt(fan_in), 1/sqrt(fan_in)).

    Stored in column-vector ("features x batch") kernel layout:
      w1 : [32, 1]   b1 : [32, 1]
      w2 : [32, 32]  b2 : [32, 1]
      w3t: [32, 1]   b3 : [1, 1]
    """
    def linear(key, fan_in, fan_out):
        kw, kb = jax.random.split(key)
        bound = 1.0 / jnp.sqrt(jnp.float32(fan_in))
        w = jax.random.uniform(kw, (fan_out, fan_in), jnp.float32, -bound, bound)
        b = jax.random.uniform(kb, (fan_out, 1), jnp.float32, -bound, bound)
        return w, b

    k1, k2, k3 = jax.random.split(key, 3)
    w1, b1 = linear(k1, 1, 32)     # [32,1], [32,1]
    w2, b2 = linear(k2, 32, 32)    # [32,32], [32,1]
    w3, b3 = linear(k3, 32, 1)     # [1,32],  [1,1]
    return (w1, b1, w2, b2, w3.T, b3)   # store w3 transposed -> [32,1]


def reference_forward(x, params):
    """Plain-JAX reference (row form), same math as the PyTorch module."""
    w1, b1, w2, b2, w3t, b3 = params
    h1 = jnp.maximum(x @ w1.T + b1.T, 0.0)    # [N, 32]
    h2 = jnp.maximum(h1 @ w2.T + b2.T, 0.0)   # [N, 32]
    return h2 @ w3t + b3                       # [N, 1]


if __name__ == "__main__":
    key = jax.random.PRNGKey(0)
    kx, kp = jax.random.split(key)

    # Small batch of scalar inputs (Net is Linear(1, ...) -> x is [N, 1]).
    # N is deliberately not a multiple of the tile to exercise the pad path.
    N = 1000
    x = jax.random.normal(kx, (N, 1), dtype=jnp.float32)
    params = init_params(kp)

    out = net_forward(x, params, tile_n=256)   # grid of 4 batch tiles
    out = jax.block_until_ready(out)

    ref = reference_forward(x, params)
    assert out.shape == (N, 1)
    assert jnp.allclose(out, ref, atol=1e-4, rtol=1e-4), "mismatch vs reference"

    print("KERNEL_OK")
</pallas_src>

<mosaic_0001>
module attributes {stable_mosaic.version = 11 : i64} {
  func.func @mlp_kernel(%arg0: i32, %arg1: memref<1x256xf32, #tpu.memory_space<vmem>>, %arg2: memref<32x1xf32, #tpu.memory_space<vmem>>, %arg3: memref<32x1xf32, #tpu.memory_space<vmem>>, %arg4: memref<32x32xf32, #tpu.memory_space<vmem>>, %arg5: memref<32x1xf32, #tpu.memory_space<vmem>>, %arg6: memref<32x1xf32, #tpu.memory_space<vmem>>, %arg7: memref<1x1xf32, #tpu.memory_space<vmem>>, %arg8: memref<1x256xf32, #tpu.memory_space<vmem>>) attributes {dimension_semantics = [#tpu.dimension_semantics<parallel>], iteration_bounds = array<i64: 4>, scalar_prefetch = 0 : i64, scratch_operands = 0 : i64, tpu.core_type = #tpu.core_type<tc>, window_params = [{transform_indices = @transform_0, window_bounds = array<i64: 1, 256>}, {pipeline_mode = #tpu.pipeline_mode<synchronous>, transform_indices = @transform_1, window_bounds = array<i64: 32, 1>}, {pipeline_mode = #tpu.pipeline_mode<synchronous>, transform_indices = @transform_2, window_bounds = array<i64: 32, 1>}, {pipeline_mode = #tpu.pipeline_mode<synchronous>, transform_indices = @transform_3, window_bounds = array<i64: 32, 32>}, {pipeline_mode = #tpu.pipeline_mode<synchronous>, transform_indices = @transform_4, window_bounds = array<i64: 32, 1>}, {pipeline_mode = #tpu.pipeline_mode<synchronous>, transform_indices = @transform_5, window_bounds = array<i64: 32, 1>}, {pipeline_mode = #tpu.pipeline_mode<synchronous>, transform_indices = @transform_6, window_bounds = array<i64: 1, 1>}, {transform_indices = @transform_7, window_bounds = array<i64: 1, 256>}]} {
    %c0 = arith.constant 0 : index
    %c0_0 = arith.constant 0 : index
    %0 = vector.load %arg1[%c0, %c0_0] : memref<1x256xf32, #tpu.memory_space<vmem>>, vector<1x256xf32>
    %c0_1 = arith.constant 0 : index
    %c0_2 = arith.constant 0 : index
    %1 = vector.load %arg2[%c0_1, %c0_2] : memref<32x1xf32, #tpu.memory_space<vmem>>, vector<32x1xf32>
    %2 = vector.broadcast %1 : vector<32x1xf32> to vector<32x256xf32>
    %3 = vector.broadcast %0 : vector<1x256xf32> to vector<32x256xf32>
    %4 = arith.mulf %2, %3 : vector<32x256xf32>
    %c0_3 = arith.constant 0 : index
    %c0_4 = arith.constant 0 : index
    %5 = vector.load %arg3[%c0_3, %c0_4] : memref<32x1xf32, #tpu.memory_space<vmem>>, vector<32x1xf32>
    %6 = vector.broadcast %5 : vector<32x1xf32> to vector<32x256xf32>
    %7 = arith.addf %4, %6 : vector<32x256xf32>
    %cst = arith.constant 0.000000e+00 : f32
    %8 = vector.broadcast %cst : f32 to vector<32x256xf32>
    %9 = arith.maximumf %7, %8 : vector<32x256xf32>
    %c0_5 = arith.constant 0 : index
    %c0_6 = arith.constant 0 : index
    %10 = vector.load %arg4[%c0_5, %c0_6] : memref<32x32xf32, #tpu.memory_space<vmem>>, vector<32x32xf32>
    %cst_7 = arith.constant dense<0.000000e+00> : vector<32x256xf32>
    %11 = tpu.matmul %10, %9, %cst_7 {dimension_numbers = #tpu.dot_dimension_numbers<[1], [0], [0], [1], [0, 0, 1, 1], [], []>} : vector<32x32xf32>, vector<32x256xf32>, vector<32x256xf32> -> vector<32x256xf32>
    %c0_8 = arith.constant 0 : index
    %c0_9 = arith.constant 0 : index
    %12 = vector.load %arg5[%c0_8, %c0_9] : memref<32x1xf32, #tpu.memory_space<vmem>>, vector<32x1xf32>
    %13 = vector.broadcast %12 : vector<32x1xf32> to vector<32x256xf32>
    %14 = arith.addf %11, %13 : vector<32x256xf32>
    %cst_10 = arith.constant 0.000000e+00 : f32
    %15 = vector.broadcast %cst_10 : f32 to vector<32x256xf32>
    %16 = arith.maximumf %14, %15 : vector<32x256xf32>
    %c0_11 = arith.constant 0 : index
    %c0_12 = arith.constant 0 : index
    %17 = vector.load %arg6[%c0_11, %c0_12] : memref<32x1xf32, #tpu.memory_space<vmem>>, vector<32x1xf32>
    %18 = vector.broadcast %17 : vector<32x1xf32> to vector<32x256xf32>
    %19 = arith.mulf %18, %16 : vector<32x256xf32>
    %cst_13 = arith.constant dense<0.000000e+00> : vector<256xf32>
    %20 = vector.multi_reduction <add>, %19, %cst_13 [0] : vector<32x256xf32> to vector<256xf32>
    %21 = vector.shape_cast %20 : vector<256xf32> to vector<1x256xf32>
    %c0_14 = arith.constant 0 : index
    %c0_15 = arith.constant 0 : index
    %22 = vector.load %arg7[%c0_14, %c0_15] : memref<1x1xf32, #tpu.memory_space<vmem>>, vector<1x1xf32>
    %23 = vector.broadcast %22 : vector<1x1xf32> to vector<1x256xf32>
    %24 = arith.addf %21, %23 : vector<1x256xf32>
    %c0_16 = arith.constant 0 : index
    %c0_17 = arith.constant 0 : index
    %25 = vector.load %arg8[%c0_16, %c0_17] : memref<1x256xf32, #tpu.memory_space<vmem>>, vector<1x256xf32>
    tpu.vector_store %arg8[%c0_16, %c0_17], %24 {strides = array<i32>} : memref<1x256xf32, #tpu.memory_space<vmem>>, vector<1x256xf32>,
    return
  }
  func.func @transform_0(%arg0: i32) -> (i32, i32) {
    %c0_i32 = arith.constant 0 : i32
    %c0_i32_0 = arith.constant 0 : i32
    return %c0_i32, %arg0 : i32, i32
  }
  func.func @transform_1(%arg0: i32) -> (i32, i32) {
    %c0_i32 = arith.constant 0 : i32
    %c0_i32_0 = arith.constant 0 : i32
    %c0_i32_1 = arith.constant 0 : i32
    return %c0_i32, %c0_i32_0 : i32, i32
  }
  func.func @transform_2(%arg0: i32) -> (i32, i32) {
    %c0_i32 = arith.constant 0 : i32
    %c0_i32_0 = arith.constant 0 : i32
    %c0_i32_1 = arith.constant 0 : i32
    return %c0_i32, %c0_i32_0 : i32, i32
  }
  func.func @transform_3(%arg0: i32) -> (i32, i32) {
    %c0_i32 = arith.constant 0 : i32
    %c0_i32_0 = arith.constant 0 : i32
    %c0_i32_1 = arith.constant 0 : i32
    return %c0_i32, %c0_i32_0 : i32, i32
  }
  func.func @transform_4(%arg0: i32) -> (i32, i32) {
    %c0_i32 = arith.constant 0 : i32
    %c0_i32_0 = arith.constant 0 : i32
    %c0_i32_1 = arith.constant 0 : i32
    return %c0_i32, %c0_i32_0 : i32, i32
  }
  func.func @transform_5(%arg0: i32) -> (i32, i32) {
    %c0_i32 = arith.constant 0 : i32
    %c0_i32_0 = arith.constant 0 : i32
    %c0_i32_1 = arith.constant 0 : i32
    return %c0_i32, %c0_i32_0 : i32, i32
  }
  func.func @transform_6(%arg0: i32) -> (i32, i32) {
    %c0_i32 = arith.constant 0 : i32
    %c0_i32_0 = arith.constant 0 : i32
    %c0_i32_1 = arith.constant 0 : i32
    return %c0_i32, %c0_i32_0 : i32, i32
  }
  func.func @transform_7(%arg0: i32) -> (i32, i32) {
    %c0_i32 = arith.constant 0 : i32
    %c0_i32_0 = arith.constant 0 : i32
    return %c0_i32, %arg0 : i32, i32
  }
}

</mosaic_0001>

<bundles_post_ra>
// kernel: tpu_custom_call.1
= control target key start
LH: loop header
LB: loop body
LE: loop exit
PB: predicated region body
PF: predicated region fallthrough
CT: control target
= control target key end

     0   :  { %s1014_s0 = inlined_call_operand.vmem [shape: f32[1,1024], index: 0, kind: input, shape index: {}]   ;;  %s1015_s1 = inlined_call_operand.vmem [shape: f32[32,1], index: 1, kind: input, shape index: {}]   ;;  %s1016_s2 = inlined_call_operand.vmem [shape: f32[32,1], index: 2, kind: input, shape index: {}]   ;;  %s1017_s3 = inlined_call_operand.vmem [shape: f32[32,32], index: 3, kind: input, shape index: {}]   ;;  %s1018_s4 = inlined_call_operand.vmem [shape: f32[32,1], index: 4, kind: input, shape index: {}]   ;;  %s1019_s5 = inlined_call_operand.vmem [shape: f32[32,1], index: 5, kind: input, shape index: {}]   ;;  %s1020_s6 = inlined_call_operand.<no memory space> [shape: f32[1,1], index: 6, kind: input, shape index: {}]   ;;  %s1021_s7 = inlined_call_operand.hbm [shape: f32[1,1024], index: 7, kind: output, shape index: {}]  }
   0x1   :  { %v12_v0 = vstv %s1020_s6 }
   0x2   :  { %13 = vst [vmem:[#allocation2] sm:$0x1] %v12_v0 }
   0x3   :  { %14 = vsyncpa [#allocation4], 0 }
   0x4   :  { %16 = vsyncpa [#allocation4 + $0x1], 0  ;;  %s840_s26 = smov 0   ;;  %s842_s27 = smov 0  }
   0x5   :  { %s844_s28 = smov 0   ;;  %s846_s29 = smov 0  }
   0x6 LB: > { %s861_s6 = sadd.s32 4294967295, %s791_s29   ;;  %s657_s30 = sadd.s32 4294967294, %s791_s29   ;;  %s791_s29 = sphi %s846_s29, %s1027_s29   ;;  %s787_s28 = sphi %s844_s28, %s1026_s28   ;;  %s783_s27 = sphi %s842_s27, %s1025_s27   ;;  %s779_s26 = sphi %s840_s26, %s1024_s26  }
   0x7   : > { %s865_s8 = sadd.s32 1, %s791_s29   ;;  %s181_s9 = sadd.s32 1, %s787_s28 }
   0x8   : > { %s178_s10 = ssub.s32 %s791_s29, %s865_s8  ;;  %p191_p0 = scmp.ne.s32.totalorder %s787_s28, %s783_s27 }
   0x9   : > { %p179_p1 = scmp.eq.s32.totalorder %s178_s10, 0  ;;  %p192_p2 = scmp.eq.s32.totalorder %s861_s6, 3 }
   0xa   : > { %p197_p3 = scmp.ne.s32.totalorder %s783_s27, %s779_s26  ;;  %p198_p4 = scmp.eq.s32.totalorder %s657_s30, 3 }
   0xb   : > { %s876_s11 = scalar_select %p179_p1, %s787_s28, %s181_s9  }
   0xc   : > { %p878_p5 = por %p192_p2, %p191_p0  ;;  %p882_p6 = por %p198_p4, %p197_p3 }
   0xd   : > { %p660_p7 = scmp.ge.s32.totalorder %s791_s29, 1  ;;  %p242_p8 = scmp.lt.s32.totalorder %s791_s29, 5 }
   0xf   : > { %p243_p9 = pnand %p660_p7, %p242_p8 }
  0x10   : > { %v323_v1 = vld [vmem:[%s1016_s2] sm:$0xff] (!%p243_p9)  ;;  %v793_v3 = vmov (!%p243_p9), 0   ;;  %v324_v4 = vld [vmem:[%s1016_s2 + $0x8] sm:$0xff] (!%p243_p9)  ;;  %v283_v6 = vld [vmem:[%s1015_s1 + $0x18] sm:$0xff] (!%p243_p9)  ;;  %v794_v16 = vmov (!%p243_p9), 0.0   ;;  %s662_s16 = sshll.u32 (!%p243_p9), %s861_s6, 1  ;;  %v305_v20 = vlaneseq (!%p243_p9) }
  0x11   : > { %246 = sbr.rel (%p243_p9) target bundleno = 431 (0x1af), region = 48  ;;  %v280_v2 = vld [vmem:[%s1015_s1] sm:$0xff] (!%p243_p9)  ;;  %728 = vset.pattern.permute.xlu1 (!%p243_p9), %v793_v3  ;;  %727 = vset.pattern.permute.xlu0 (!%p243_p9), %v793_v3  ;;  %v281_v5 = vld [vmem:[%s1015_s1 + $0x8] sm:$0xff] (!%p243_p9)  ;;  %v282_v7 = vld [vmem:[%s1015_s1 + $0x10] sm:$0xff] (!%p243_p9)  ;;  %p274_p10 = scmp.lt.s32.totalorder (!%p243_p9), %s662_s16, 7  ;;  %vm391_vm0 = vcmask (!%p243_p9), 261120  }
  0x12   : > { %329 = vperm.xlu1 (!%p243_p9), %728, %v323_v1   ;;  %286 = vperm.xlu0 (!%p243_p9), %727, %v280_v2   ;;  %v326_v8 = vld [vmem:[%s1016_s2 + $0x18] sm:$0xff] (!%p243_p9)  ;;  %v325_v9 = vld [vmem:[%s1016_s2 + $0x10] sm:$0xff] (!%p243_p9)  ;;  %v368_v10 = vld [vmem:[%s1018_s4 + $0x8] sm:$0xff] (!%p243_p9)  ;;  %v940_v21 = vshrl.u32 (!%p243_p9), %v305_v20, 7  ;;  %s270_s10 = sand.u32 (!%p243_p9), 1, %s783_s27   ;;  %s672_s15 = sshll.u32 (!%p243_p9), %s861_s6, 5 }
  0x13   : > { %v367_v11 = vld [vmem:[%s1018_s4] sm:$0xff] (!%p243_p9)  ;;  %v370_v12 = vld [vmem:[%s1018_s4 + $0x18] sm:$0xff] (!%p243_p9)  ;;  %v369_v13 = vld [vmem:[%s1018_s4 + $0x10] sm:$0xff] (!%p243_p9)  ;;  %468 = vmatprep.mubr.f32.mxu0 (!%p243_p9), %v794_v16  ;;  %480 = vmatprep.mubr.f32.mxu1 (!%p243_p9), %v794_v16  ;;  %s661_s14 = sshll.u32 (!%p243_p9), %s270_s10, 1  ;;  %vm583_vm1 = vcmp.lt.s32.totalorder (!%p243_p9), %v305_v20, 256  ;;  %s972_s20 = scalar_lea.hbm (!%p243_p9), %s1021_s7, %s672_s15 }
  0x14   : > { %v502_v14 = vld [vmem:[%s1019_s5 + $0x8] sm:$0xff] (!%p243_p9)  ;;  %v501_v15 = vld [vmem:[%s1019_s5] sm:$0xff] (!%p243_p9)  ;;  %v504_v17 = vld [vmem:[%s1019_s5 + $0x18] sm:$0xff] (!%p243_p9)  ;;  %v307_v22 = vsub.s32 (!%p243_p9), 0, %v940_v21  ;;  %v311_v23 = vsub.s32 (!%p243_p9), 1, %v940_v21  ;;  %s587_s21 = scalar_lea.sflag (!%p243_p9), [#allocation4], %s270_s10 }
  0x15   : > { %v503_v18 = vld [vmem:[%s1019_s5 + $0x10] sm:$0xff] (!%p243_p9)  ;;  %v551_v19 = vld [vmem:[#allocation2] sm:$0x1] (!%p243_p9)  ;;  %v364_v1 = vld [vmem:[%s1017_s3 + $0x8] sm:$0xff] (!%p243_p9)  ;;  %s796_s6 = smov (!%p243_p9), [#allocation3]  }
  0x16   : > { %334 = vperm.xlu1 (!%p243_p9), %728, %v324_v4   ;;  %291 = vperm.xlu0 (!%p243_p9), %727, %v281_v5   ;;  %v363_v63 = vld [vmem:[%s1017_s3] sm:$0xff] (!%p243_p9)  ;;  %v365_v0 = vld [vmem:[%s1017_s3 + $0x10] sm:$0xff] (!%p243_p9)  ;;  %v366_v2 = vld [vmem:[%s1017_s3 + $0x18] sm:$0xff] (!%p243_p9)  ;;  %s733_s23 = sshll.u32 (!%p243_p9), %s796_s6, 4  ;;  %s734_s23 = int_to_ptr.vmem [resolvable:$false] %s733_s23 }
  0x17   : > { %s735_s24 = scalar_lea.vmem (!%p243_p9), %s734_s23, 64 }
  0x18   : > { %s1029_s16 = smov (!%p274_p10, %s662_s16), 7 }
  0x19   : > { %s276_s19 = scalar_lea.vmem %s1014_s0, %s1029_s16  ;;  %s272_s16 = scalar_lea.vmem [#allocation3], %s661_s14 }
  0x1a   : > { %301 = vperm.xlu1 %728, %v283_v6   ;;  %296 = vperm.xlu0 %727, %v282_v7   ;;  %v279_v24 = vld [vmem:[%s276_s19] sm:$0x3]  ;;  %s601_s17 = sshll.u32 %s272_s16, 4  ;;  %s974_s17 = int_to_ptr.vmem [resolvable:$true] %s601_s17 }
  0x1b   : > { %v308_v25 = vrot.slane %v279_v24, %v307_v22  ;;  %v312_v26 = vrot.slane %v279_v24, %v311_v23  ;;  %s729_s22 = scalar_lea.vmem %s974_s17, 32  ;;  %p736_p0 = scmp.lt.s32.totalorder %s974_s17, %s734_s23 }
  0x1c   : > { %p730_p11 = scmp.ne.s32.totalorder %s974_s17, %s729_s22  ;;  %p737_p1 = scmp.lt.s32.totalorder %s735_s24, %s729_s22 }
  0x1e   : > { %344 = vperm.xlu1 %728, %v326_v8   ;;  %339 = vperm.xlu0 %727, %v325_v9   ;;  %p731_p12 = pnand %p730_p11, %p878_p5  ;;  %p738_p2 = por %p737_p1, %p736_p0 }
  0x20   : > { %p732_p13 = pneg %p731_p12 }
  0x22   : > { %378 = vperm.xlu1 %728, %v368_v10   ;;  %373 = vperm.xlu0 %727, %v367_v11   ;;  %p739_p3 = pnand %p738_p2, %p732_p13 }
  0x26   : > { %388 = vperm.xlu1 %728, %v370_v12   ;;  %383 = vperm.xlu0 %727, %v369_v13  }
  0x2a   : > { %512 = vperm.xlu1 %728, %v502_v14   ;;  %507 = vperm.xlu0 %727, %v501_v15  }
  0x2e   : > { %522 = vperm.xlu1 %728, %v504_v17   ;;  %517 = vperm.xlu0 %727, %v503_v18  }
  0x32   : > { %554 = vperm.xlu0 %727, %v551_v19  }
  0x91   : > { %v330_v27 = vpop.permute.xlu1 %329  ;;  %v287_v28 = vpop.permute.xlu0 %286 }
  0x92   : > { %v315_v29 = vmul.f32 %v308_v25, %v287_v28  ;;  %v316_v30 = vmul.f32 %v312_v26, %v287_v28 }
  0x94   : > { %v347_v35 = vadd.f32 %v330_v27, %v315_v29  ;;  %v348_v36 = vadd.f32 %v330_v27, %v316_v30 }
  0x95   : > { %v335_v31 = vpop.permute.xlu1 %334  ;;  %v292_v32 = vpop.permute.xlu0 %291 }
  0x96   : > { %v317_v33 = vmul.f32 %v308_v25, %v292_v32  ;;  %v318_v34 = vmul.f32 %v312_v26, %v292_v32  ;;  %v356_v41 = vmax.f32 %v348_v36, 0.0  ;;  %v355_v43 = vmax.f32 %v347_v35, 0.0 }
  0x98   : > { %v349_v37 = vadd.f32 %v335_v31, %v317_v33  ;;  %v350_v38 = vadd.f32 %v335_v31, %v318_v34 }
  0x99   : > { %v302_v39 = vpop.permute.xlu1 %301  ;;  %v297_v40 = vpop.permute.xlu0 %296 }
  0x9a   : > { %v358_v42 = vmax.f32 %v350_v38, 0.0  ;;  %v357_v44 = vmax.f32 %v349_v37, 0.0  ;;  %v321_v45 = vmul.f32 %v308_v25, %v302_v39  ;;  %v322_v46 = vmul.f32 %v312_v26, %v302_v39 }
  0x9b   : > { %v319_v47 = vmul.f32 %v308_v25, %v297_v40  ;;  %v320_v48 = vmul.f32 %v312_v26, %v297_v40 }
  0x9c   : > { %v673_v51 = vpack.c.bf16 %v358_v42, %v356_v41  ;;  %v675_v52 = vpack.c.bf16 %v357_v44, %v355_v43 }
  0x9d   : > { %v345_v49 = vpop.permute.xlu1 %344  ;;  %v340_v50 = vpop.permute.xlu0 %339 }
  0x9e   : > { %v353_v53 = vadd.f32 %v345_v49, %v321_v45  ;;  %v354_v54 = vadd.f32 %v345_v49, %v322_v46  ;;  %v351_v55 = vadd.f32 %v340_v50, %v319_v47  ;;  %v352_v56 = vadd.f32 %v340_v50, %v320_v48  ;;  %674 = vmatprep.subr.bf16.mxu0 %v673_v51 }
  0x9f   : > { %681 = vmatprep.subr.bf16.mxu1 %v673_v51  ;;  %676 = vmatpush1.bf16.msra.mxu0 %v675_v52 }
  0xa0   : > { %v361_v57 = vmax.f32 %v353_v53, 0.0  ;;  %v362_v58 = vmax.f32 %v354_v54, 0.0  ;;  %v359_v59 = vmax.f32 %v351_v55, 0.0  ;;  %v360_v60 = vmax.f32 %v352_v56, 0.0  ;;  %683 = vmatpush1.bf16.msra.mxu1 %v675_v52 }
  0xa1   : > { %v374_v3 = vpop.permute.xlu0 %373  ;;  %v379_v4 = vpop.permute.xlu1 %378 }
  0xa2   : > { %v677_v61 = vpack.c.bf16 %v362_v58, %v360_v60  ;;  %v679_v62 = vpack.c.bf16 %v361_v57, %v359_v59  ;;  %v795_v58 = vmov 1966171168  }
  0xa3   : > { %v567_v59 = vunpack.c.l.s4 %v795_v58 }
  0xa4   : > { %678 = vmatprep.subr.bf16.mxu0 %v677_v61  ;;  %682 = vmatprep.subr.bf16.mxu1 %v677_v61 }
  0xa5   : > { %680 = vmatpush1.bf16.msra.mxu0 %v679_v62  ;;  %684 = vmatpush1.bf16.msra.mxu1 %v679_v62  ;;  %v384_v5 = vpop.permute.xlu0 %383  ;;  %v389_v6 = vpop.permute.xlu1 %388 }
  0xa8   : > { %663 = vmatmul.mubr.msk.f32.vlgmr.msra.gmra.mrb[0].mxu0 %vm391_vm0, %v363_v63  ;;  %665 = vmatmul.mubr.msk.f32.vlgmr.msra.gmra.mrb[0].mxu1 %vm391_vm0, %v365_v0 }
  0xa9   : > { %474 = vmatprep.mubr.f32.mxu0 %v794_v16  ;;  %486 = vmatprep.mubr.f32.mxu1 %v794_v16  ;;  %v508_v13 = vpop.permute.xlu0 %507  ;;  %v513_v26 = vpop.permute.xlu1 %512 }
  0xac   : > { %664 = vmatmul.mubr.msk.f32.gmra.mrb[2].mxu0 %vm391_vm0, %v364_v1  ;;  %666 = vmatmul.mubr.msk.f32.gmra.mrb[2].mxu1 %vm391_vm0, %v366_v2  ;;  %v568_v1 = vunpack.c.0.s8 %v567_v59 }
  0xad   : > { %v518_v37 = vpop.permute.xlu0 %517  ;;  %v523_v43 = vpop.permute.xlu1 %522 }
  0xb1   : > { %v555_v61 = vpop.permute.xlu0 %554 }
  0xb2   : > { %v560_v2 = vrot.slane %v555_v61, %v307_v22 }
 0x17b   : > { %v470_v7 = vpop.f32.mrb[0].mxu0  ;;  %v482_v8 = vpop.f32.mrb[0].mxu1 }
 0x17c   : > { %v471_v9 = vadd.f32 %v470_v7, %v374_v3  ;;  %v472_v10 = vpop.f32.mrb[1].mxu0  ;;  %v484_v11 = vpop.f32.mrb[1].mxu1  ;;  %v483_v14 = vadd.f32 %v482_v8, %v384_v5  ;;  %v571_v7 = vsub.s32 %v568_v1, %v940_v21 }
 0x17d   : > { %v473_v12 = vadd.f32 %v472_v10, %v374_v3  ;;  %v485_v15 = vadd.f32 %v484_v11, %v384_v5 }
 0x17e   : > { %v493_v18 = vmax.f32 %v471_v9, 0.0  ;;  %v497_v30 = vmax.f32 %v483_v14, 0.0 }
 0x17f   : > { %v476_v16 = vpop.f32.mrb[2].mxu0  ;;  %v488_v17 = vpop.f32.mrb[2].mxu1  ;;  %v494_v27 = vmax.f32 %v473_v12, 0.0  ;;  %v498_v32 = vmax.f32 %v485_v15, 0.0 }
 0x180   : > { %v477_v19 = vadd.f32 %v476_v16, %v379_v4  ;;  %v489_v23 = vadd.f32 %v488_v17, %v389_v6  ;;  %v478_v24 = vpop.f32.mrb[3].mxu0  ;;  %v490_v25 = vpop.f32.mrb[3].mxu1  ;;  %v525_v34 = vmul.f32 %v508_v13, %v493_v18  ;;  %v529_v41 = vmul.f32 %v518_v37, %v497_v30 }
 0x181   : > { %v479_v28 = vadd.f32 %v478_v24, %v379_v4  ;;  %v491_v29 = vadd.f32 %v490_v25, %v389_v6  ;;  %v526_v38 = vmul.f32 %v508_v13, %v494_v27  ;;  %v530_v44 = vmul.f32 %v518_v37, %v498_v32 }
 0x182   : > { %v495_v31 = vmax.f32 %v477_v19, 0.0  ;;  %v499_v36 = vmax.f32 %v489_v23, 0.0 }
 0x183   : > { %v496_v33 = vmax.f32 %v479_v28, 0.0  ;;  %v500_v40 = vmax.f32 %v491_v29, 0.0 }
 0x184   : > { %v527_v35 = vmul.f32 %v513_v26, %v495_v31  ;;  %v531_v46 = vmul.f32 %v523_v43, %v499_v36 }
 0x185   : > { %v528_v39 = vmul.f32 %v513_v26, %v496_v33  ;;  %v532_v48 = vmul.f32 %v523_v43, %v500_v40 }
 0x186   : > { %v533_v42 = vadd.f32 %v527_v35, %v525_v34 }
 0x187   : > { %v542_v45 = vadd.f32 %v528_v39, %v526_v38 }
 0x188   : > { %v534_v47 = vadd.f32 %v533_v42, %v529_v41 }
 0x189   : > { %v543_v49 = vadd.f32 %v542_v45, %v530_v44 }
 0x18a   : > { %v535_v50 = vadd.f32 %v534_v47, %v531_v46 }
 0x18b   : > { %v544_v51 = vadd.f32 %v543_v49, %v532_v48 }
 0x18c   : > { %v536_v52 = vrot.slane %v535_v50, 4 }
 0x18d   : > { %v545_v53 = vrot.slane %v544_v51, 4 }
 0x18e   : > { %v537_v54 = vadd.f32 %v536_v52, %v535_v50 }
 0x18f   : > { %v546_v55 = vadd.f32 %v545_v53, %v544_v51 }
 0x190   : > { %v538_v56 = vrot.slane %v537_v54, 2 }
 0x191   : > { %v547_v57 = vrot.slane %v546_v55, 2 }
 0x192   : > { %v539_v60 = vadd.f32 %v538_v56, %v537_v54 }
 0x193   : > { %v548_v62 = vadd.f32 %v547_v57, %v546_v55 }
 0x194   : > { %v540_v63 = vrot.slane %v539_v60, 1 }
 0x195   : > { %v549_v0 = vrot.slane %v548_v62, 1 }
 0x196   : > { %v541_v3 = vadd.f32 %v540_v63, %v539_v60 }
 0x197   : > { %v550_v4 = vadd.f32 %v549_v0, %v548_v62 }
 0x198   : > { %v561_v5 = vadd.f32 %v560_v2, %v541_v3 }
 0x199   : > { %v562_v6 = vadd.f32 %v560_v2, %v550_v4 }
 0x19b   : > { %v565_v8 = vcombine.low %v561_v5, %v562_v6 }
 0x19d   : > { %v572_v9 = vrot.slane %v565_v8, %v571_v7 }
 0x19f   : > { %v579_v10 = vrot.slane %v572_v9, %v571_v7 }
 0x1a1   : > { %585 = vst.msk [vmem:[%s272_s16] sm:$0x3] %vm583_vm1, %v579_v10 }
 0x1a2   : > { %742 = shalt.err (!%p739_p3)
}
 0x1a3   : > { %s743_s25 = scalar_lea.hbm %s972_s20, 32  ;;  %s747_s10 = scalar_lea.hbm %s1021_s7, 128 }
 0x1a4   : > { %p744_p4 = scmp.ne.s32.totalorder %s972_s20, %s743_s25  ;;  %p748_p9 = scmp.lt.u32.totalorder %s972_s20, %s1021_s7 }
 0x1a5   : > { %p749_p10 = scmp.lt.u32.totalorder %s747_s10, %s743_s25  ;;  %p751_p12 = scmp.lt.u32.totalorder %s743_s25, %s972_s20 }
 0x1a6   : > { %p745_p7 = pnand %p744_p4, %p878_p5 }
 0x1a7   : > { %p750_p11 = por %p749_p10, %p748_p9 }
 0x1a8   : > { %p746_p8 = pneg %p745_p7 }
 0x1a9   : > { %p752_p13 = por %p751_p12, %p750_p11 }
 0x1ab   : > { %p753_p0 = pnand %p752_p13, %p746_p8 }
 0x1ad   : > { %756 = shalt.err (!%p753_p0)
}
 0x1ae   : > { %685 = dma.vmem_to_hbm [thread:$0]  (%p878_p5), %s974_s17, 32, %s972_s20, %s587_s21  }
 0x1af PF: > { %p691_p1 = scmp.ge.s32.totalorder %s791_s29, 2  ;;  %s613_s16 = sand.u32 1, %s779_s26  }
 0x1b0   : > { %s614_s18 = scalar_lea.sflag [#allocation4], %s613_s16 }
 0x1b1   : > { %p688_p2 = pnand %p691_p1, %p882_p6 }
 0x1b3   : > { %774 = dma.done.wait (!%p688_p2), %s614_s18, 32  }
 0x1b4   : > { %776 = vsyncadd (!%p688_p2), %s614_s18, 4294967264  ;;  %p19_p3 = scmp.ge.s32.totalorder %s865_s8, 6   ;;  %s1024_s26 = smov %s783_s27 }
 0x1b5   : > { %s1025_s27 = smov %s787_s28  ;;  %s1026_s28 = smov %s876_s11 }
 0x1b6   : > { %s1027_s29 = smov %s865_s8  ;;  %21 = sbr.rel (!%p19_p3) target bundleno = 6 (0x6), region = 83 }
 0x1bd   :  { %619 = vsyncpa [#allocation4], 1 }
 0x1be   :  { %621 = vsyncpa [#allocation4 + $0x1], 1 }

</bundles_post_ra>
